<compile_context>
chip_gen: v7x
topology: tpu7x:2x2x1
jax: 0.10.0
libtpu: 0.0.40
codegen_flags: <defaults>
</compile_context>

<pallas_src>
import functools

import jax
import jax.numpy as jnp
import numpy as np
from jax import lax
from jax.experimental import pallas as pl
from jax.experimental.pallas import tpu as pltpu

_INV_SQRT2 = 0.7071067811865475
_LANE = 128
_VMEM_LIMIT_BYTES = 48 * 1024 * 1024   # below v7x's 64 MiB physical VMEM


def _gelu_exact(x):
    # matches torch.nn.functional.gelu(approximate='none'); keep in f32.
    return 0.5 * x * (1.0 + lax.erf(x * _INV_SQRT2))


def _round_up(x, m):
    return (x + m - 1) // m * m


# ------------------------------ fused kernel ------------------------------ #

def _conv_block_kernel(*refs, K, d, pad, L, TL, has_proj):
    """One ConvBlock (proj + pre-GELU conv1 + pre-GELU conv2 + residual add)
    for one (batch row, L tile) grid cell.

    refs (in order):
      x_ref  : (1, L, Cin_p)   full-length input row (channel padded, f32)
      w1_ref : (K*Cin_p, C_p)  conv1 weights, im2col-folded, bf16
      b1_ref : (1, C_p)        f32
      w2_ref : (K*C_p, C_p)    conv2 weights, im2col-folded, bf16
      b2_ref : (1, C_p)        f32
      wp_ref : (Cin_p, C_p)    [has_proj] 1x1 projection weights, bf16
      bp_ref : (1, C_p)        [has_proj] f32
      o_ref  : (1, TL, C_p)    output tile
      g1_ref : (L4r, Cin_p)    VMEM scratch: gelu(x), zero-extended by 2*pad
    """
    if has_proj:
        x_ref, w1_ref, b1_ref, w2_ref, b2_ref, wp_ref, bp_ref, o_ref, g1_ref = refs
    else:
        x_ref, w1_ref, b1_ref, w2_ref, b2_ref, o_ref, g1_ref = refs
        wp_ref = bp_ref = None

    l = pl.program_id(1)
    ext = 2 * pad                      # left zero-extension of the g1 scratch
    th = TL + (K - 1) * d              # h rows needed for this output tile
    l4r = g1_ref.shape[0]
    cin_p = g1_ref.shape[1]

    # --- once per batch row: g1 = gelu(x), zero-extended ------------------- #
    # gelu(0) == 0, so gelu-before-zero-padding equals F.gelu(x) followed by
    # the conv's own zero padding.
    @pl.when(l == 0)
    def _init_g1():
        if ext > 0:
            g1_ref[0:ext, :] = jnp.zeros((ext, cin_p), g1_ref.dtype)
        tail = l4r - (ext + L)
        if tail > 0:
            g1_ref[ext + L:l4r, :] = jnp.zeros((tail, cin_p), g1_ref.dtype)
        xg = _gelu_exact(x_ref[0].astype(jnp.float32))
        g1_ref[ext:ext + L, :] = xg.astype(g1_ref.dtype)

    t0 = l * TL                        # first output position of this tile

    # --- conv1 over tile + halo: im2col -> one deep MXU matmul ------------- #
    xcat = jnp.concatenate(
        [g1_ref[pl.ds(t0 + k * d, th), :].astype(jnp.bfloat16)
         for k in range(K)], axis=-1)                       # (th, K*Cin_p)
    h = jnp.dot(xcat, w1_ref[...], preferred_element_type=jnp.float32)
    h = h + b1_ref[...].astype(jnp.float32)

    # conv1 output only exists on positions [0, L) (SamePadConv trim); halo
    # rows outside that range are conv2's zero padding.
    row = lax.broadcasted_iota(jnp.int32, (th, 1), 0)
    s = row + (t0 - pad)               # original h position of each row
    h = jnp.where((s >= 0) & (s < L), h, 0.0)
    g2 = _gelu_exact(h).astype(jnp.bfloat16)                # gelu(0) == 0

    # --- conv2 over the TL output rows: im2col -> one MXU matmul ----------- #
    g2cat = jnp.concatenate(
        [g2[k * d:k * d + TL, :] for k in range(K)], axis=-1)  # (TL, K*C_p)
    acc = jnp.dot(g2cat, w2_ref[...], preferred_element_type=jnp.float32)
    acc = acc + b2_ref[...].astype(jnp.float32)

    # --- residual (stays in VMEM, never written to HBM) -------------------- #
    xr = x_ref[0, pl.ds(t0, TL), :]
    if has_proj:
        res = jnp.dot(xr.astype(jnp.bfloat16), wp_ref[...],
                      preferred_element_type=jnp.float32)
        res = res + bp_ref[...].astype(jnp.float32)
    else:
        res = xr.astype(jnp.float32)   # Cin_p == C_p in this case

    o_ref[0] = (acc + res).astype(o_ref.dtype)


# ------------------------------ host wrappers ------------------------------ #

def _choose_tile_l(L, halo):
    """Full L when short; otherwise the smallest multiple-of-8 divisor of L
    that is >= max(1024, 2*halo) (bounds VMEM and the per-tile halo recompute)."""
    if L <= 2048:
        return L
    tl = min(_round_up(max(1024, 2 * halo), 8), L)
    while tl < L:
        if L % tl == 0:
            return tl
        tl += 8
    return L


def _fold_conv_weight(w, cin_p, cout_p):
    """(K, Cin, Cout) conv weight -> (K*Cin_p, Cout_p) bf16, zero padded."""
    k, cin, cout = w.shape
    wp = jnp.zeros((k, cin_p, cout_p), jnp.float32).at[:, :cin, :cout].set(w)
    return wp.reshape(k * cin_p, cout_p).astype(jnp.bfloat16)


def _pad_bias(b, cout_p):
    return jnp.zeros((1, cout_p), jnp.float32).at[0, :b.shape[0]].set(b)


def conv_block_forward(x, blk, *, tile_l=None):
    """Fused ConvBlock forward.

    x: (N, L, Cin_p) float32, channel-padded to a multiple of 128.
    Returns (N, L, C_p) float32, channel-padded (padded lanes stay zero).
    """
    N, L, cin_p = x.shape
    K, _, cout = blk["w1"].shape
    d = int(blk["dilation"])
    c_p = _round_up(cout, _LANE)
    rf = (K - 1) * d + 1
    pad = rf // 2

    if tile_l is not None and 0 < tile_l <= L and L % tile_l == 0 and tile_l % 8 == 0:
        tl = int(tile_l)
    else:
        tl = _choose_tile_l(L, 2 * (K - 1) * d)
    n_l = L // tl
    l4r = _round_up(L + 4 * pad, 8)

    w1f = _fold_conv_weight(blk["w1"], cin_p, c_p)
    w2f = _fold_conv_weight(blk["w2"], c_p, c_p)
    b1p = _pad_bias(blk["b1"], c_p)
    b2p = _pad_bias(blk["b2"], c_p)
    has_proj = blk["proj_w"] is not None
    if not has_proj:
        assert cin_p == c_p, "identity residual requires equal padded widths"

    in_specs = [
        pl.BlockSpec((1, L, cin_p), lambda n, l: (n, 0, 0)),   # x: once per row
        pl.BlockSpec((K * cin_p, c_p), lambda n, l: (0, 0)),
        pl.BlockSpec((1, c_p), lambda n, l: (0, 0)),
        pl.BlockSpec((K * c_p, c_p), lambda n, l: (0, 0)),
        pl.BlockSpec((1, c_p), lambda n, l: (0, 0)),
    ]
    args = [x, w1f, b1p, w2f, b2p]
    if has_proj:
        wpf = _fold_conv_weight(blk["proj_w"], cin_p, c_p)
        bpp = _pad_bias(blk["proj_b"], c_p)
        in_specs += [pl.BlockSpec((cin_p, c_p), lambda n, l: (0, 0)),
                     pl.BlockSpec((1, c_p), lambda n, l: (0, 0))]
        args += [wpf, bpp]

    kernel = functools.partial(
        _conv_block_kernel, K=K, d=d, pad=pad, L=L, TL=tl, has_proj=has_proj)

    return pl.pallas_call(
        kernel,
        out_shape=jax.ShapeDtypeStruct((N, L, c_p), x.dtype),
        grid=(N, n_l),
        in_specs=in_specs,
        out_specs=pl.BlockSpec((1, tl, c_p), lambda n, l: (n, l, 0)),
        scratch_shapes=[pltpu.VMEM((l4r, cin_p), jnp.float32)],
        compiler_params=pltpu.CompilerParams(
            dimension_semantics=("parallel", "arbitrary"),
            vmem_limit_bytes=_VMEM_LIMIT_BYTES),
    )(*args)


def dilated_conv_encoder(x_ncl, params, *, tile_l=None):
    """Forward pass. x_ncl: (N, C_in, L) -> (N, channels[-1], L)."""
    _, c_in, _ = x_ncl.shape
    x = jnp.transpose(x_ncl, (0, 2, 1)).astype(jnp.float32)   # -> (N, L, C)
    cin_p = _round_up(c_in, _LANE)
    if cin_p != c_in:   # one-time channel pad -> lane-dense layers throughout
        x = jnp.pad(x, ((0, 0), (0, 0), (0, cin_p - c_in)))
    for blk in params:
        x = conv_block_forward(x, blk, tile_l=tile_l)
    c_last = params[-1]["w2"].shape[2]
    x = x[:, :, :c_last]
    return jnp.transpose(x, (0, 2, 1))                        # back to NCL


# --------------------------- parameter construction ------------------------ #

def _uniform(key, shape, fan_in):
    bound = 1.0 / float(np.sqrt(fan_in))
    return jax.random.uniform(key, shape, jnp.float32, -bound, bound)


def init_encoder_params(key, in_channels, channels, kernel_size):
    """Mirrors DilatedConvEncoder.__init__ shapes (weights in (K, Cin, Cout))."""
    params = []
    c_prev = in_channels
    for i, c_out in enumerate(channels):
        final = (i == len(channels) - 1)
        key, k1, k2, k3, k4, k5, k6 = jax.random.split(key, 7)
        blk = {"dilation": 2 ** i}
        blk["w1"] = _uniform(k1, (kernel_size, c_prev, c_out), c_prev * kernel_size)
        blk["b1"] = _uniform(k2, (c_out,), c_prev * kernel_size)
        blk["w2"] = _uniform(k3, (kernel_size, c_out, c_out), c_out * kernel_size)
        blk["b2"] = _uniform(k4, (c_out,), c_out * kernel_size)
        if c_prev != c_out or final:
            blk["proj_w"] = _uniform(k5, (1, c_prev, c_out), c_prev)
            blk["proj_b"] = _uniform(k6, (c_out,), c_prev)
        else:
            blk["proj_w"] = None
            blk["proj_b"] = None
        params.append(blk)
        c_prev = c_out
    return params


# ------------------------- pure-JAX f32 reference -------------------------- #

def _ref_conv(x, w, b, dilation):
    K = w.shape[0]
    pad = ((K - 1) * dilation + 1) // 2
    out = lax.conv_general_dilated(
        x, w, window_strides=(1,), padding=[(pad, pad)],
        rhs_dilation=(dilation,),
        dimension_numbers=("NHC", "HIO", "NHC"))
    return out[:, :x.shape[1], :] + b    # trim == SamePadConv.remove


def reference_encoder(x_ncl, params):
    x = jnp.transpose(x_ncl, (0, 2, 1))
    for blk in params:
        d = blk["dilation"]
        residual = (x if blk["proj_w"] is None
                    else _ref_conv(x, blk["proj_w"], blk["proj_b"], 1))
        h = _ref_conv(jax.nn.gelu(x, approximate=False), blk["w1"], blk["b1"], d)
        x = _ref_conv(jax.nn.gelu(h, approximate=False), blk["w2"], blk["b2"], d)
        x = x + residual
    return jnp.transpose(x, (0, 2, 1))


# --------------------------------- main ------------------------------------ #

if __name__ == "__main__":
    key = jax.random.PRNGKey(0)
    in_channels = 4
    channels = [8, 8, 16]      # dilations 1, 2, 4
    kernel_size = 3

    kx, kx2, kp = jax.random.split(key, 3)
    params = init_encoder_params(kp, in_channels, channels, kernel_size)

    # Kernel uses bf16 MXU operands (f32 accumulation) vs an all-f32 reference,
    # so compare with bf16-appropriate tolerances.
    TOL = dict(rtol=5e-2, atol=5e-2)

    # config 1: tiny shapes, single L tile per batch row
    N, L = 2, 16
    x = jax.random.normal(kx, (N, in_channels, L), jnp.float32)
    out = jax.block_until_ready(dilated_conv_encoder(x, params))
    ref = jax.block_until_ready(reference_encoder(x, params))
    assert out.shape == (N, channels[-1], L)
    np.testing.assert_allclose(np.asarray(out), np.asarray(ref), **TOL)

    # config 2: force the L-tiled path (t0 > 0, halo masking, scratch reuse)
    L2 = 64
    x2 = jax.random.normal(kx2, (N, in_channels, L2), jnp.float32)
    out2 = jax.block_until_ready(dilated_conv_encoder(x2, params, tile_l=32))
    ref2 = jax.block_until_ready(reference_encoder(x2, params))
    assert out2.shape == (N, channels[-1], L2)
    np.testing.assert_allclose(np.asarray(out2), np.asarray(ref2), **TOL)

    print("KERNEL_OK")
</pallas_src>

<mosaic_0001>
module attributes {stable_mosaic.version = 11 : i64} {
  func.func @_conv_block_kernel(%arg0: i32, %arg1: i32, %arg2: memref<1x16x128xf32, #tpu.memory_space<vmem>>, %arg3: memref<384x128xbf16, #tpu.memory_space<vmem>>, %arg4: memref<1x128xf32, #tpu.memory_space<vmem>>, %arg5: memref<384x128xbf16, #tpu.memory_space<vmem>>, %arg6: memref<1x128xf32, #tpu.memory_space<vmem>>, %arg7: memref<128x128xbf16, #tpu.memory_space<vmem>>, %arg8: memref<1x128xf32, #tpu.memory_space<vmem>>, %arg9: memref<1x16x128xf32, #tpu.memory_space<vmem>>, %arg10: memref<24x128xf32, #tpu.memory_space<vmem>>) attributes {dimension_semantics = [#tpu.dimension_semantics<parallel>, #tpu.dimension_semantics<arbitrary>], iteration_bounds = array<i64: 2, 1>, scalar_prefetch = 0 : i64, scratch_operands = 1 : i64, tpu.core_type = #tpu.core_type<tc>, window_params = [{transform_indices = @transform_0, window_bounds = array<i64: 1, 16, 128>}, {pipeline_mode = #tpu.pipeline_mode<synchronous>, transform_indices = @transform_1, window_bounds = array<i64: 384, 128>}, {pipeline_mode = #tpu.pipeline_mode<synchronous>, transform_indices = @transform_2, window_bounds = array<i64: 1, 128>}, {pipeline_mode = #tpu.pipeline_mode<synchronous>, transform_indices = @transform_3, window_bounds = array<i64: 384, 128>}, {pipeline_mode = #tpu.pipeline_mode<synchronous>, transform_indices = @transform_4, window_bounds = array<i64: 1, 128>}, {pipeline_mode = #tpu.pipeline_mode<synchronous>, transform_indices = @transform_5, window_bounds = array<i64: 128, 128>}, {pipeline_mode = #tpu.pipeline_mode<synchronous>, transform_indices = @transform_6, window_bounds = array<i64: 1, 128>}, {transform_indices = @transform_7, window_bounds = array<i64: 1, 16, 128>}]} {
    %c0_i32 = arith.constant 0 : i32
    %0 = arith.cmpi eq, %arg1, %c0_i32 : i32
    %1 = arith.extui %0 : i1 to i32
    %c0_i32_0 = arith.constant 0 : i32
    %2 = arith.cmpi ne, %1, %c0_i32_0 : i32
    scf.if %2 {
      %cst_30 = arith.constant 0.000000e+00 : f32
      %66 = vector.broadcast %cst_30 : f32 to vector<2x128xf32>
      %c0_31 = arith.constant 0 : index
      %c0_32 = arith.constant 0 : index
      %67 = vector.load %arg10[%c0_31, %c0_32] : memref<24x128xf32, #tpu.memory_space<vmem>>, vector<2x128xf32>
      tpu.vector_store %arg10[%c0_31, %c0_32], %66 {strides = array<i32>} : memref<24x128xf32, #tpu.memory_space<vmem>>, vector<2x128xf32>,
      %cst_33 = arith.constant 0.000000e+00 : f32
      %68 = vector.broadcast %cst_33 : f32 to vector<6x128xf32>
      %c18 = arith.constant 18 : index
      %c0_34 = arith.constant 0 : index
      %69 = vector.load %arg10[%c18, %c0_34] : memref<24x128xf32, #tpu.memory_space<vmem>>, vector<6x128xf32>
      tpu.vector_store %arg10[%c18, %c0_34], %68 {strides = array<i32>} : memref<24x128xf32, #tpu.memory_space<vmem>>, vector<6x128xf32>,
      %c0_35 = arith.constant 0 : index
      %c0_36 = arith.constant 0 : index
      %c0_37 = arith.constant 0 : index
      %70 = vector.load %arg2[%c0_35, %c0_36, %c0_37] : memref<1x16x128xf32, #tpu.memory_space<vmem>>, vector<1x16x128xf32>
      %71 = vector.shape_cast %70 : vector<1x16x128xf32> to vector<16x128xf32>
      %cst_38 = arith.constant 5.000000e-01 : f32
      %72 = vector.broadcast %cst_38 : f32 to vector<16x128xf32>
      %73 = arith.mulf %72, %71 : vector<16x128xf32>
      %cst_39 = arith.constant 0.707106769 : f32
      %74 = vector.broadcast %cst_39 : f32 to vector<16x128xf32>
      %75 = arith.mulf %71, %74 : vector<16x128xf32>
      %76 = math.erf %75 : vector<16x128xf32>
      %cst_40 = arith.constant 1.000000e+00 : f32
      %77 = vector.broadcast %cst_40 : f32 to vector<16x128xf32>
      %78 = arith.addf %77, %76 : vector<16x128xf32>
      %79 = arith.mulf %73, %78 : vector<16x128xf32>
      %c2 = arith.constant 2 : index
      %c0_41 = arith.constant 0 : index
      %80 = vector.load %arg10[%c2, %c0_41] : memref<24x128xf32, #tpu.memory_space<vmem>>, vector<16x128xf32>
      tpu.vector_store %arg10[%c2, %c0_41], %79 {strides = array<i32>} : memref<24x128xf32, #tpu.memory_space<vmem>>, vector<16x128xf32>,
    } else {
    }
    %c16_i32 = arith.constant 16 : i32
    %3 = arith.muli %arg1, %c16_i32 : i32
    %c0_i32_1 = arith.constant 0 : i32
    %4 = arith.addi %3, %c0_i32_1 : i32
    %5 = arith.index_cast %4 : i32 to index
    %c0 = arith.constant 0 : index
    %6 = vector.load %arg10[%5, %c0] : memref<24x128xf32, #tpu.memory_space<vmem>>, vector<18x128xf32>
    %7 = arith.truncf %6 : vector<18x128xf32> to vector<18x128xbf16>
    %c1_i32 = arith.constant 1 : i32
    %8 = arith.addi %3, %c1_i32 : i32
    %9 = arith.index_cast %8 : i32 to index
    %c0_2 = arith.constant 0 : index
    %10 = vector.load %arg10[%9, %c0_2] : memref<24x128xf32, #tpu.memory_space<vmem>>, vector<18x128xf32>
    %11 = arith.truncf %10 : vector<18x128xf32> to vector<18x128xbf16>
    %c2_i32 = arith.constant 2 : i32
    %12 = arith.addi %3, %c2_i32 : i32
    %13 = arith.index_cast %12 : i32 to index
    %c0_3 = arith.constant 0 : index
    %14 = vector.load %arg10[%13, %c0_3] : memref<24x128xf32, #tpu.memory_space<vmem>>, vector<18x128xf32>
    %15 = arith.truncf %14 : vector<18x128xf32> to vector<18x128xbf16>
    %16 = tpu.concatenate %7, %11, %15 in 1 : vector<18x128xbf16>, vector<18x128xbf16>, vector<18x128xbf16> -> vector<18x384xbf16>
    %c0_4 = arith.constant 0 : index
    %c0_5 = arith.constant 0 : index
    %17 = vector.load %arg3[%c0_4, %c0_5] : memref<384x128xbf16, #tpu.memory_space<vmem>>, vector<384x128xbf16>
    %cst = arith.constant dense<0.000000e+00> : vector<18x128xf32>
    %18 = tpu.matmul %16, %17, %cst {dimension_numbers = #tpu.dot_dimension_numbers<[1], [0], [0], [1], [0, 0, 1, 1], [], []>} : vector<18x384xbf16>, vector<384x128xbf16>, vector<18x128xf32> -> vector<18x128xf32>
    %c0_6 = arith.constant 0 : index
    %c0_7 = arith.constant 0 : index
    %19 = vector.load %arg4[%c0_6, %c0_7] : memref<1x128xf32, #tpu.memory_space<vmem>>, vector<1x128xf32>
    %20 = vector.broadcast %19 : vector<1x128xf32> to vector<18x128xf32>
    %21 = arith.addf %18, %20 : vector<18x128xf32>
    %22 = tpu.iota {dimensions = array<i32: 0>} : vector<18x1xi32>
    %c1_i32_8 = arith.constant 1 : i32
    %23 = arith.subi %3, %c1_i32_8 : i32
    %24 = vector.broadcast %23 : i32 to vector<18x1xi32>
    %25 = arith.addi %22, %24 : vector<18x1xi32>
    %c0_i32_9 = arith.constant 0 : i32
    %26 = vector.broadcast %c0_i32_9 : i32 to vector<18x1xi32>
    %27 = arith.cmpi sge, %25, %26 : vector<18x1xi32>
    %c16_i32_10 = arith.constant 16 : i32
    %28 = vector.broadcast %c16_i32_10 : i32 to vector<18x1xi32>
    %29 = arith.cmpi slt, %25, %28 : vector<18x1xi32>
    %30 = arith.andi %27, %29 : vector<18x1xi1>
    %cst_11 = arith.constant 0.000000e+00 : f32
    %31 = vector.shape_cast %30 : vector<18x1xi1> to vector<18x1xi1>
    %32 = vector.broadcast %31 : vector<18x1xi1> to vector<18x128xi1>
    %33 = vector.broadcast %cst_11 : f32 to vector<18x128xf32>
    %34 = arith.select %32, %21, %33 : vector<18x128xi1>, vector<18x128xf32>
    %cst_12 = arith.constant 5.000000e-01 : f32
    %35 = vector.broadcast %cst_12 : f32 to vector<18x128xf32>
    %36 = arith.mulf %35, %34 : vector<18x128xf32>
    %cst_13 = arith.constant 0.707106769 : f32
    %37 = vector.broadcast %cst_13 : f32 to vector<18x128xf32>
    %38 = arith.mulf %34, %37 : vector<18x128xf32>
    %39 = math.erf %38 : vector<18x128xf32>
    %cst_14 = arith.constant 1.000000e+00 : f32
    %40 = vector.broadcast %cst_14 : f32 to vector<18x128xf32>
    %41 = arith.addf %40, %39 : vector<18x128xf32>
    %42 = arith.mulf %36, %41 : vector<18x128xf32>
    %43 = arith.truncf %42 : vector<18x128xf32> to vector<18x128xbf16>
    %44 = vector.extract_strided_slice %43 {offsets = [0, 0], sizes = [16, 128], strides = [1, 1]} : vector<18x128xbf16> to vector<16x128xbf16>
    %45 = vector.extract_strided_slice %43 {offsets = [1, 0], sizes = [16, 128], strides = [1, 1]} : vector<18x128xbf16> to vector<16x128xbf16>
    %46 = vector.extract_strided_slice %43 {offsets = [2, 0], sizes = [16, 128], strides = [1, 1]} : vector<18x128xbf16> to vector<16x128xbf16>
    %47 = tpu.concatenate %44, %45, %46 in 1 : vector<16x128xbf16>, vector<16x128xbf16>, vector<16x128xbf16> -> vector<16x384xbf16>
    %c0_15 = arith.constant 0 : index
    %c0_16 = arith.constant 0 : index
    %48 = vector.load %arg5[%c0_15, %c0_16] : memref<384x128xbf16, #tpu.memory_space<vmem>>, vector<384x128xbf16>
    %cst_17 = arith.constant dense<0.000000e+00> : vector<16x128xf32>
    %49 = tpu.matmul %47, %48, %cst_17 {dimension_numbers = #tpu.dot_dimension_numbers<[1], [0], [0], [1], [0, 0, 1, 1], [], []>} : vector<16x384xbf16>, vector<384x128xbf16>, vector<16x128xf32> -> vector<16x128xf32>
    %c0_18 = arith.constant 0 : index
    %c0_19 = arith.constant 0 : index
    %50 = vector.load %arg6[%c0_18, %c0_19] : memref<1x128xf32, #tpu.memory_space<vmem>>, vector<1x128xf32>
    %51 = vector.broadcast %50 : vector<1x128xf32> to vector<16x128xf32>
    %52 = arith.addf %49, %51 : vector<16x128xf32>
    %c0_20 = arith.constant 0 : index
    %53 = arith.index_cast %3 : i32 to index
    %c0_21 = arith.constant 0 : index
    %54 = vector.load %arg2[%c0_20, %53, %c0_21] : memref<1x16x128xf32, #tpu.memory_space<vmem>>, vector<1x16x128xf32>
    %55 = vector.shape_cast %54 : vector<1x16x128xf32> to vector<16x128xf32>
    %56 = arith.truncf %55 : vector<16x128xf32> to vector<16x128xbf16>
    %c0_22 = arith.constant 0 : index
    %c0_23 = arith.constant 0 : index
    %57 = vector.load %arg7[%c0_22, %c0_23] : memref<128x128xbf16, #tpu.memory_space<vmem>>, vector<128x128xbf16>
    %cst_24 = arith.constant dense<0.000000e+00> : vector<16x128xf32>
    %58 = tpu.matmul %56, %57, %cst_24 {dimension_numbers = #tpu.dot_dimension_numbers<[1], [0], [0], [1], [0, 0, 1, 1], [], []>} : vector<16x128xbf16>, vector<128x128xbf16>, vector<16x128xf32> -> vector<16x128xf32>
    %c0_25 = arith.constant 0 : index
    %c0_26 = arith.constant 0 : index
    %59 = vector.load %arg8[%c0_25, %c0_26] : memref<1x128xf32, #tpu.memory_space<vmem>>, vector<1x128xf32>
    %60 = vector.broadcast %59 : vector<1x128xf32> to vector<16x128xf32>
    %61 = arith.addf %58, %60 : vector<16x128xf32>
    %62 = arith.addf %52, %61 : vector<16x128xf32>
    %c0_27 = arith.constant 0 : index
    %c0_28 = arith.constant 0 : index
    %c0_29 = arith.constant 0 : index
    %63 = vector.load %arg9[%c0_27, %c0_28, %c0_29] : memref<1x16x128xf32, #tpu.memory_space<vmem>>, vector<1x16x128xf32>
    %64 = vector.shape_cast %63 : vector<1x16x128xf32> to vector<16x128xf32>
    %65 = vector.shape_cast %62 : vector<16x128xf32> to vector<1x16x128xf32>
    tpu.vector_store %arg9[%c0_27, %c0_28, %c0_29], %65 {strides = array<i32>} : memref<1x16x128xf32, #tpu.memory_space<vmem>>, vector<1x16x128xf32>,
    return
  }
  func.func @transform_0(%arg0: i32, %arg1: i32) -> (i32, i32, i32) {
    %c0_i32 = arith.constant 0 : i32
    %c0_i32_0 = arith.constant 0 : i32
    %c0_i32_1 = arith.constant 0 : i32
    return %arg0, %c0_i32, %c0_i32_0 : i32, i32, i32
  }
  func.func @transform_1(%arg0: i32, %arg1: i32) -> (i32, i32) {
    %c0_i32 = arith.constant 0 : i32
    %c0_i32_0 = arith.constant 0 : i32
    %c0_i32_1 = arith.constant 0 : i32
    return %c0_i32, %c0_i32_0 : i32, i32
  }
  func.func @transform_2(%arg0: i32, %arg1: i32) -> (i32, i32) {
    %c0_i32 = arith.constant 0 : i32
    %c0_i32_0 = arith.constant 0 : i32
    %c0_i32_1 = arith.constant 0 : i32
    return %c0_i32, %c0_i32_0 : i32, i32
  }
  func.func @transform_3(%arg0: i32, %arg1: i32) -> (i32, i32) {
    %c0_i32 = arith.constant 0 : i32
    %c0_i32_0 = arith.constant 0 : i32
    %c0_i32_1 = arith.constant 0 : i32
    return %c0_i32, %c0_i32_0 : i32, i32
  }
  func.func @transform_4(%arg0: i32, %arg1: i32) -> (i32, i32) {
    %c0_i32 = arith.constant 0 : i32
    %c0_i32_0 = arith.constant 0 : i32
    %c0_i32_1 = arith.constant 0 : i32
    return %c0_i32, %c0_i32_0 : i32, i32
  }
  func.func @transform_5(%arg0: i32, %arg1: i32) -> (i32, i32) {
    %c0_i32 = arith.constant 0 : i32
    %c0_i32_0 = arith.constant 0 : i32
    %c0_i32_1 = arith.constant 0 : i32
    return %c0_i32, %c0_i32_0 : i32, i32
  }
  func.func @transform_6(%arg0: i32, %arg1: i32) -> (i32, i32) {
    %c0_i32 = arith.constant 0 : i32
    %c0_i32_0 = arith.constant 0 : i32
    %c0_i32_1 = arith.constant 0 : i32
    return %c0_i32, %c0_i32_0 : i32, i32
  }
  func.func @transform_7(%arg0: i32, %arg1: i32) -> (i32, i32, i32) {
    %c0_i32 = arith.constant 0 : i32
    %c0_i32_0 = arith.constant 0 : i32
    return %arg0, %arg1, %c0_i32 : i32, i32, i32
  }
}

</mosaic_0001>

<bundles_post_ra>
// kernel: tpu_custom_call.1
= control target key start
LH: loop header
LB: loop body
LE: loop exit
PB: predicated region body
PF: predicated region fallthrough
CT: control target
= control target key end

     0   :  { %s2296_s0 = inlined_call_operand.hbm [shape: f32[2,16,128], index: 0, kind: input, shape index: {}]   ;;  %s2297_s1 = inlined_call_operand.hbm [shape: bf16[384,128], index: 1, kind: input, shape index: {}]   ;;  %s2298_s2 = inlined_call_operand.vmem [shape: f32[1,128], index: 2, kind: input, shape index: {}]   ;;  %s2299_s3 = inlined_call_operand.hbm [shape: bf16[384,128], index: 3, kind: input, shape index: {}]   ;;  %s2300_s4 = inlined_call_operand.vmem [shape: f32[1,128], index: 4, kind: input, shape index: {}]   ;;  %s2301_s5 = inlined_call_operand.hbm [shape: bf16[128,128], index: 5, kind: input, shape index: {}]   ;;  %s2302_s6 = inlined_call_operand.vmem [shape: f32[1,128], index: 6, kind: input, shape index: {}]   ;;  %s2303_s7 = inlined_call_operand.hbm [shape: f32[2,16,128], index: 7, kind: output, shape index: {}]  }
   0x1   :  { %2311 = sst [smem:[#allocation18_spill]] %s2302_s6 }
   0x2   :  { %2312 = sst [smem:[#allocation19_spill]] %s2303_s7 }
   0x3   :  { %12 = vsyncpa [#allocation4], 0 }
   0x4   :  { %14 = vsyncpa [#allocation4 + $0x1], 0 }
   0x5   :  { %15 = vsyncpa [#allocation7], 0 }
   0x6   :  { %16 = vsyncpa [#allocation10], 0 }
   0x7   :  { %17 = vsyncpa [#allocation5], 0 }
   0x8   :  { %19 = vsyncpa [#allocation5 + $0x1], 0  ;;  %s1958_s24 = smov 0   ;;  %s1960_s25 = smov 0  }
   0x9   :  { %s1962_s26 = smov 0   ;;  %s1964_s27 = smov 0  }
   0xa   :  { %s1966_s28 = smov 0   ;;  %s1968_s29 = smov 0  }
   0xb LB: > { %2313 = sst [smem:[#allocation16_spill]] %s1883_s24  ;;  %s1298_s30 = sadd.s32 4294967295, %s1903_s29   ;;  %s1903_s29 = sphi %s1968_s29, %s25_s29   ;;  %s1899_s28 = sphi %s1966_s28, %s2338_s28   ;;  %s1895_s27 = sphi %s1964_s27, %s2337_s27   ;;  %s1891_s26 = sphi %s1962_s26, %s2336_s26   ;;  %s1887_s25 = sphi %s1960_s25, %s2335_s25   ;;  %s1883_s24 = sphi %s1958_s24, %s2334_s24  }
   0xc   : > { %s1299_s8 = sadd.s32 4294967294, %s1903_s29   ;;  %p57_p0 = scmp.ne.s32.totalorder %s1887_s25, %s1883_s24 }
   0xd   : > { %p1992_p1 = scmp.eq.s32.totalorder %s1298_s30, 0  ;;  %p1996_p2 = scmp.eq.s32.totalorder %s1298_s30, 1 }
   0xe   : > { %p215_p3 = scmp.eq.s32.totalorder %s1299_s8, 1  ;;  %p1300_p5 = scmp.ge.s32.totalorder %s1903_s29, 1 }
   0xf   : > { %s2314_s9 = scalar_select %p1992_p1, 1, 0 }
  0x10   : > { %s2315_s10 = scalar_select %p1996_p2, 1, 0 }
  0x11   : > { %p2002_p4 = por %p1992_p1, %p57_p0  ;;  %p2007_p6 = por %p215_p3, %p57_p0 }
  0x12   : > { %p222_p7 = scmp.lt.s32.totalorder %s1903_s29, 3  ;;  %s1905_s14 = smov [#allocation6]  }
  0x13   : > { %s2316_s11 = scalar_select %p2002_p4, 1, 0 }
  0x14   : > { %s2317_s12 = scalar_select %p2007_p6, 1, 0 }
  0x15   : > { %p2012_p8 = pnand %p1300_p5, %p222_p7  ;;  %s234_s15 = sshll.u32 %s1905_s14, 4  ;;  %s2016_s15 = int_to_ptr.vmem [resolvable:$true] %s234_s15 }
  0x16   : > { %2318 = sst [smem:[#allocation17_spill]] %s2317_s12  ;;  %s1906_s17 = smov [#allocation8]  }
  0x17   : > { %s2319_s13 = scalar_select %p2012_p8, 1, 0 }
  0x18   : > { %p1548_p9 = pneg %p2012_p8  ;;  %s250_s18 = sshll.u32 %s1906_s17, 4  ;;  %s2027_s18 = int_to_ptr.vmem [resolvable:$true] %s250_s18 }
  0x19   : > { %s1907_s19 = smov [#allocation9]   ;;  %s1699_s23 = scalar_lea.hbm %s2297_s1, 3072 }
  0x1a   : > { %p2023_p11 = pnand %p1548_p9, %p1992_p1  ;;  %s2029_s20 = sshll.u32 %s1907_s19, 4  ;;  %s267_s20 = int_to_ptr.vmem [resolvable:$true] %s2029_s20 }
  0x1b   : > { %p1700_p12 = scmp.ne.s32.totalorder %s2297_s1, %s1699_s23  ;;  %p1706_p5 = scmp.lt.u32.totalorder %s1699_s23, %s2297_s1 }
  0x1c   : > { %p2039_p13 = pneg %p2023_p11 }
  0x1e   : > { %p1702_p0 = pnand %p2039_p13, %p1700_p12 }
  0x20   : > { %p1703_p3 = pneg %p1702_p0 }
  0x22   : > { %p1708_p7 = pnand %p1706_p5, %p1703_p3 }
  0x24   : > { %1711 = shalt.err (!%p1708_p7)
}
  0x25   : > { %s1712_s21 = scalar_lea.vmem %s2016_s15, 3072  ;;  %p1720_p1 = scmp.lt.s32.totalorder %s2016_s15, %s2016_s15 }
  0x26   : > { %p1713_p9 = scmp.ne.s32.totalorder %s2016_s15, %s1712_s21  ;;  %p1721_p4 = scmp.lt.s32.totalorder %s1712_s21, %s1712_s21 }
  0x28   : > { %p1715_p10 = pnand %p1713_p9, %p2039_p13  ;;  %p1722_p12 = por %p1721_p4, %p1720_p1 }
  0x2a   : > { %p1716_p6 = pneg %p1715_p10 }
  0x2c   : > { %p1723_p0 = pnand %p1722_p12, %p1716_p6 }
  0x2e   : > { %1726 = shalt.err (!%p1723_p0)
}
  0x2f   : > { %s1908_s22 = smov 64   ;;  %s1909_s23 = smov 4  }
  0x30   : > { %1551 = dma.hbm_to_vmem [thread:$0]  (!%p2023_p11), %s2297_s1, 3072, %s2016_s15, [#allocation7], %s1908_s22, %s1908_s22, %s1909_s23  }
  0x31   : > { %s1727_s21 = scalar_lea.hbm %s2299_s3, 3072 }
  0x32   : > { %p1728_p1 = scmp.ne.s32.totalorder %s2299_s3, %s1727_s21  ;;  %p1734_p10 = scmp.lt.u32.totalorder %s1727_s21, %s2299_s3 }
  0x34   : > { %p1730_p4 = pnand %p1728_p1, %p2039_p13 }
  0x36   : > { %p1731_p6 = pneg %p1730_p4 }
  0x38   : > { %p1736_p3 = pnand %p1734_p10, %p1731_p6 }
  0x3a   : > { %1739 = shalt.err (!%p1736_p3)
}
  0x3b   : > { %s1740_s15 = scalar_lea.vmem %s2027_s18, 3072  ;;  %p1748_p12 = scmp.lt.s32.totalorder %s2027_s18, %s2027_s18 }
  0x3c   : > { %p1741_p5 = scmp.ne.s32.totalorder %s2027_s18, %s1740_s15  ;;  %p1749_p0 = scmp.lt.s32.totalorder %s1740_s15, %s1740_s15 }
  0x3e   : > { %p1743_p7 = pnand %p1741_p5, %p2039_p13  ;;  %p1750_p1 = por %p1749_p0, %p1748_p12 }
  0x40   : > { %p1744_p9 = pneg %p1743_p7 }
  0x42   : > { %p1751_p4 = pnand %p1750_p1, %p1744_p9 }
  0x44   : > { %1754 = shalt.err (!%p1751_p4)
}
  0x45   : > { %1554 = dma.hbm_to_vmem [thread:$0]  (!%p2023_p11), %s2299_s3, 3072, %s2027_s18, [#allocation7], %s1908_s22, %s1908_s22, %s1909_s23  }
  0x46   : > { %s1755_s30 = scalar_lea.hbm %s2301_s5, 1024 }
  0x47   : > { %p1756_p6 = scmp.ne.s32.totalorder %s2301_s5, %s1755_s30  ;;  %p1762_p5 = scmp.lt.u32.totalorder %s1755_s30, %s2301_s5 }
  0x49   : > { %p1758_p10 = pnand %p1756_p6, %p2039_p13 }
  0x4b   : > { %p1759_p3 = pneg %p1758_p10 }
  0x4d   : > { %p1764_p7 = pnand %p1762_p5, %p1759_p3 }
  0x4f   : > { %1767 = shalt.err (!%p1764_p7)
}
  0x50   : > { %s1768_s15 = scalar_lea.vmem %s267_s20, 1024  ;;  %p1776_p1 = scmp.lt.s32.totalorder %s267_s20, %s267_s20 }
  0x51   : > { %p1769_p9 = scmp.ne.s32.totalorder %s267_s20, %s1768_s15  ;;  %p1777_p4 = scmp.lt.s32.totalorder %s1768_s15, %s1768_s15 }
  0x53   : > { %p1771_p12 = pnand %p1769_p9, %p2039_p13  ;;  %p1778_p8 = por %p1777_p4, %p1776_p1 }
  0x55   : > { %p1772_p0 = pneg %p1771_p12 }
  0x57   : > { %p1779_p2 = pnand %p1778_p8, %p1772_p0 }
  0x59   : > { %1782 = shalt.err (!%p1779_p2)
}
  0x5a   : > { %1557 = dma.hbm_to_vmem [thread:$0]  (!%p2023_p11), %s2301_s5, 1024, %s267_s20, [#allocation10], %s1908_s22, %s1908_s22, %s1909_s23  }
  0x5b   : > { %s44_s14 = sadd.s32 1, %s1891_s26  ;;  %s37_s16 = sadd.s32 1, %s1899_s28 }
  0x5c   : > { %p51_p2 = scmp.ne.s32.totalorder %s1891_s26, %s1887_s25  ;;  %p39_p8 = scmp.ge.s32.totalorder %s37_s16, 2 }
  0x5d   : > { %p52_p13 = scmp.eq.s32.totalorder %s1903_s29, 0  ;;  %p2322_p6 = scmp.ne.s32.totalorder %s2315_s10, 0 }
  0x5e   : > { %p1569_p3 = scmp.lt.s32.totalorder %s1903_s29, 2  ;;  %s2340_s16 = smov (%p39_p8, %s37_s16), 0 }
  0x5f   : > { %p2118_p10 = por %p2322_p6, %p51_p2  ;;  %p53_p5 = por %p52_p13, %p51_p2 }
  0x60   : > { %s283_s24 = sand.u32 1, %s1891_s26   ;;  %s41_s12 = ssub.s32 %s1899_s28, %s2340_s16 }
  0x61   : > { %p42_p7 = scmp.eq.s32.totalorder %s41_s12, 0  ;;  %s1305_s20 = sshll.u32 %s283_s24, 4 }
  0x62   : > { %s1384_s22 = sshll.u32 %s1899_s28, 8  ;;  %s287_s17 = scalar_lea.vmem [#allocation3], %s1305_s20 }
  0x63   : > { %s2130_s23 = scalar_select %p42_p7, %s1891_s26, %s44_s14  }
  0x64   : > { %s2135_s10 = scalar_lea.hbm %s2296_s0, %s1384_s22  ;;  %s294_s19 = sshll.u32 %s287_s17, 4  ;;  %s2137_s19 = int_to_ptr.vmem [resolvable:$true] %s294_s19 }
  0x65   : > { %p2141_p11 = pnand %p1569_p3, %p53_p5  ;;  %s2145_s15 = scalar_lea.sflag [#allocation4], %s283_s24 }
  0x66   : > { %s1783_s18 = scalar_lea.hbm %s2135_s10, 256  ;;  %s1788_s12 = scalar_lea.hbm %s2296_s0, 512 }
  0x67   : > { %p1784_p9 = scmp.ne.s32.totalorder %s2135_s10, %s1783_s18  ;;  %p1785_p12 = pneg %p2141_p11 }
  0x68   : > { %p1789_p4 = scmp.lt.u32.totalorder %s2135_s10, %s2296_s0  ;;  %p1790_p2 = scmp.lt.u32.totalorder %s1788_s12, %s1783_s18 }
  0x69   : > { %p1786_p0 = pnand %p1785_p12, %p1784_p9  ;;  %p1792_p13 = scmp.lt.u32.totalorder %s1783_s18, %s2135_s10 }
  0x6a   : > { %p1791_p8 = por %p1790_p2, %p1789_p4 }
  0x6b   : > { %p1787_p1 = pneg %p1786_p0 }
  0x6c   : > { %p1793_p6 = por %p1792_p13, %p1791_p8 }
  0x6e   : > { %p1794_p3 = pnand %p1793_p6, %p1787_p1 }
  0x70   : > { %1797 = shalt.err (!%p1794_p3)
}
  0x71   : > { %s1798_s24 = scalar_lea.vmem %s2137_s19, 256  ;;  %s1910_s30 = smov [#allocation3]  }
  0x72   : > { %p1799_p5 = scmp.ne.s32.totalorder %s2137_s19, %s1798_s24  ;;  %s1803_s8 = sshll.u32 %s1910_s30, 4  ;;  %s1804_s8 = int_to_ptr.vmem [resolvable:$false] %s1803_s8 }
  0x73   : > { %s1805_s17 = scalar_lea.vmem %s1804_s8, 512  ;;  %p1806_p0 = scmp.lt.s32.totalorder %s2137_s19, %s1804_s8 }
  0x74   : > { %p1801_p7 = pnand %p1799_p5, %p1785_p12  ;;  %p1807_p4 = scmp.lt.s32.totalorder %s1805_s17, %s1798_s24 }
  0x76   : > { %p1802_p9 = pneg %p1801_p7  ;;  %p1808_p2 = por %p1807_p4, %p1806_p0 }
  0x78   : > { %p1809_p8 = pnand %p1808_p2, %p1802_p9 }
  0x7a   : > { %1812 = shalt.err (!%p1809_p8)
}
  0x7b   : > { %s1911_s18 = smov 128   ;;  %s1912_s6 = smov 8  }
  0x7c   : > { %1561 = dma.hbm_to_vmem [thread:$0]  (!%p2141_p11), %s2135_s10, 256, %s2137_s19, %s2145_s15, %s1911_s18, %s1911_s18, %s1912_s6  }
  0x7d   : > { %p2325_p12 = scmp.ne.s32.totalorder %s2319_s13, 0 }
  0x7e   : > { %s2176_s14 = sand.u32 (!%p2325_p12), 1, %s1887_s25   ;;  %p2326_p1 = scmp.ne.s32.totalorder (!%p2325_p12), %s2316_s11, 0 }
  0x7f   : > { %306 = sbr.rel (%p2325_p12) target bundleno = 692 (0x2b4), region = 48  ;;  %s1309_s12 = sshll.u32 (!%p2325_p12), %s2176_s14, 4 }
  0x80   : > { %s309_s20 = scalar_lea.sflag (!%p2325_p12), [#allocation4], %s2176_s14  ;;  %s2182_s22 = scalar_lea.vmem (!%p2325_p12), [#allocation3], %s1309_s12 }
  0x86   : > { %1866 = dma.done.wait (%p2326_p1), %s309_s20, 256  }
  0x87   : > { %1868 = vsyncadd (%p2326_p1), %s309_s20, 4294967040  ;;  %p2327_p11 = scmp.ne.s32.totalorder %s2314_s9, 0 }
  0x89   : > { %1870 = dma.done.wait (%p2327_p11), [#allocation7], 6144  }
  0x8a   : > { %1872 = vsyncadd (%p2327_p11), [#allocation7], 4294961152 }
  0x8b   : > { %1874 = dma.done.wait (%p2327_p11), [#allocation10], 1024  }
  0x8c   : > { %1876 = vsyncadd (%p2327_p11), [#allocation10], 4294966272  ;;  %v1913_v0 = vmov 0.0   ;;  %v1633_v1 = vld [vmem:[#allocation6 + $0x40] sm:$0xff]   ;;  %v1635_v3 = vld [vmem:[#allocation6 + $0x48] sm:$0xff]   ;;  %vm1914_vm0 = vmmov 0  }
  0x8d   : > { %361 = vst [vmem:[#allocation2] sm:$0x3] %v1913_v0  ;;  %362 = vst [vmem:[#allocation2 + $0x12] sm:$0x3f] %v1913_v0  ;;  %v1634_v2 = vld [vmem:[#allocation6] sm:$0xff]   ;;  %1386 = vmatprep.subr.bf16.mxu0 %v1633_v1  ;;  %v1637_v5 = vld [vmem:[#allocation6 + $0x8] sm:$0xff]  }
  0x8e   : > { %1387 = vmatpush3.bf16.msra.mxu0 %v1634_v2  ;;  %v1636_v4 = vld [vmem:[#allocation6 + $0x80] sm:$0xff]   ;;  %v1638_v6 = vld [vmem:[#allocation6 + $0x50] sm:$0xff]   ;;  %v1639_v7 = vld [vmem:[#allocation6 + $0x88] sm:$0xff]   ;;  %vm753_vm3 = vcmask 1046528   ;;  %vm737_vm4 = vsmask.f32 7424 }
  0x8f   : > { %1388 = vmatprep.subr.bf16.mxu0 %v1635_v3  ;;  %1464 = vmatprep.subr.bf16.mxu1 %v1636_v4  ;;  %v1640_v8 = vld [vmem:[#allocation6 + $0x10] sm:$0xff]   ;;  %v1641_v9 = vld [vmem:[#allocation6 + $0x58] sm:$0xff]   ;;  %v1644_v12 = vld [vmem:[#allocation6 + $0x60] sm:$0xff]   ;;  %s2328_s15 = sld [smem:[#allocation18_spill]]  ;;  %s354_s24 = scalar_lea.vmem [#allocation11], %s1309_s12 }
  0x90   : > { %1465 = vmatpush3.bf16.msra.mxu1 %v1636_v4  ;;  %v1642_v10 = vld [vmem:[#allocation6 + $0x90] sm:$0xff]   ;;  %v1643_v11 = vld [vmem:[#allocation6 + $0x18] sm:$0xff]   ;;  %v1646_v14 = vld [vmem:[#allocation6 + $0x20] sm:$0xff]   ;;  %s1175_s30 = sshll.u32 %s354_s24, 4  ;;  %s1385_s8 = sshll.u32 %s1895_s27, 8  ;;  %s2242_s30 = int_to_ptr.vmem [resolvable:$true] %s1175_s30 }
  0x91   : > { %1466 = vmatprep.subr.bf16.mxu1 %v1639_v7  ;;  %v1645_v13 = vld [vmem:[#allocation6 + $0x98] sm:$0xff]   ;;  %v1648_v15 = vld [vmem:[#allocation6 + $0xa0] sm:$0xff]   ;;  %v1647_v16 = vld [vmem:[#allocation6 + $0x68] sm:$0xff]   ;;  %s2329_s6 = sld [smem:[#allocation19_spill]]  ;;  %s1160_s27 = scalar_lea.sflag [#allocation5], %s2176_s14 }
  0x92   : > { %1389 = vmatpush3.bf16.msra.mxu0 %v1637_v5  ;;  %v1649_v17 = vld [vmem:[#allocation6 + $0x28] sm:$0xff]   ;;  %v1650_v19 = vld [vmem:[#allocation6 + $0x70] sm:$0xff]   ;;  %v1653_v24 = vld [vmem:[#allocation6 + $0x78] sm:$0xff]   ;;  %s1813_s12 = scalar_lea.vmem %s2242_s30, 256 }
  0x93   : > { %1390 = vmatprep.subr.bf16.mxu0 %v1638_v6  ;;  %v1651_v18 = vld [vmem:[#allocation6 + $0xa8] sm:$0xff]   ;;  %v1652_v20 = vld [vmem:[#allocation6 + $0x30] sm:$0xff]   ;;  %v1655_v27 = vld [vmem:[#allocation6 + $0x38] sm:$0xff]   ;;  %p1814_p13 = scmp.ne.s32.totalorder %s2242_s30, %s1813_s12 }
  0x94   : > { %1467 = vmatpush3.bf16.msra.mxu1 %v1639_v7  ;;  %v1654_v21 = vld [vmem:[#allocation6 + $0xb0] sm:$0xff]   ;;  %v2202_v23 = vld [vmem:[%s2182_s22 + $0x8] sm:$0xff]  ;;  %v1657_v50 = vld [vmem:[#allocation8 + $0x80] sm:$0xff]  }
  0x95   : > { %1468 = vmatprep.subr.bf16.mxu1 %v1642_v10  ;;  %v2199_v22 = vld [vmem:[%s2182_s22] sm:$0xff]  ;;  %v368_v26 = vmul.f32 0.70710677, %v2202_v23  ;;  %v366_v29 = vmul.f32 0.5, %v2202_v23  ;;  %v1656_v30 = vld [vmem:[#allocation6 + $0xb8] sm:$0xff]   ;;  %v1660_v53 = vld [vmem:[#allocation8 + $0x88] sm:$0xff]   ;;  %p1815_p6 = pnand %p1814_p13, %p2118_p10 }
  0x96   : > { %1391 = vmatpush3.bf16.msra.mxu0 %v1640_v8  ;;  %v367_v25 = vmul.f32 0.70710677, %v2199_v22  ;;  %v365_v28 = vmul.f32 0.5, %v2199_v22  ;;  %v1319_v32 = vld [vmem:[#allocation2 + $0x12] sm:$0x3]  ;;  %v1658_v51 = vld [vmem:[#allocation8 + $0x40] sm:$0xff]  }
  0x97   : > { %1392 = vmatprep.subr.bf16.mxu0 %v1641_v9  ;;  %v397_v38 = vpack.c.bf16 %v1319_v32, %v1319_v32  ;;  %v1659_v52 = vld [vmem:[#allocation8] sm:$0xff]   ;;  %v1661_v54 = vld [vmem:[#allocation8 + $0x48] sm:$0xff]   ;;  %v1663_v56 = vld [vmem:[#allocation8 + $0x90] sm:$0xff]   ;;  %s2247_s20 = scalar_lea.hbm %s2329_s6, %s1385_s8  ;;  %p1816_p3 = pneg %p1815_p6 }
  0x98   : > { %1469 = vmatpush3.bf16.msra.mxu1 %v1642_v10  ;;  %1689 = verf.f32 %v367_v25  ;;  %v1662_v55 = vld [vmem:[#allocation8 + $0x8] sm:$0xff]   ;;  %v1664_v57 = vld [vmem:[#allocation8 + $0x50] sm:$0xff]   ;;  %v1666_v59 = vld [vmem:[#allocation8 + $0x98] sm:$0xff]   ;;  %s1915_s22 = smov [#allocation11]  }
  0x99   : > { %1470 = vmatprep.subr.bf16.mxu1 %v1645_v13  ;;  %1691 = verf.f32 %v368_v26  ;;  %v1665_v58 = vld [vmem:[#allocation8 + $0x10] sm:$0xff]   ;;  %v1667_v60 = vld [vmem:[#allocation8 + $0x58] sm:$0xff]   ;;  %v1669_v62 = vld [vmem:[#allocation8 + $0xa0] sm:$0xff]   ;;  %s1817_s9 = sshll.u32 %s1915_s22, 4  ;;  %s1818_s9 = int_to_ptr.vmem [resolvable:$false] %s1817_s9 }
  0x9a   : > { %1393 = vmatpush3.bf16.msra.mxu0 %v1643_v11  ;;  %v1668_v61 = vld [vmem:[#allocation8 + $0x18] sm:$0xff]   ;;  %v1670_v63 = vld [vmem:[#allocation8 + $0x60] sm:$0xff]   ;;  %v1672_v2 = vld [vmem:[#allocation8 + $0xa8] sm:$0xff]   ;;  %s1819_s11 = scalar_lea.vmem %s1818_s9, 512  ;;  %p1820_p5 = scmp.lt.s32.totalorder %s2242_s30, %s1818_s9 }
  0x9b   : > { %1394 = vmatprep.subr.bf16.mxu0 %v1644_v12  ;;  %v1671_v1 = vld [vmem:[#allocation8 + $0x20] sm:$0xff]   ;;  %v1673_v3 = vld [vmem:[#allocation8 + $0x68] sm:$0xff]   ;;  %v1675_v5 = vld [vmem:[#allocation8 + $0xb0] sm:$0xff]   ;;  %p1821_p7 = scmp.lt.s32.totalorder %s1819_s11, %s1813_s12 }
  0x9c   : > { %1471 = vmatpush3.bf16.msra.mxu1 %v1645_v13  ;;  %v1674_v4 = vld [vmem:[#allocation8 + $0x28] sm:$0xff]   ;;  %v1676_v6 = vld [vmem:[#allocation8 + $0x70] sm:$0xff]   ;;  %v1678_v8 = vld [vmem:[#allocation8 + $0xb8] sm:$0xff]   ;;  %v693_v13 = vlaneseq }
  0x9d   : > { %1472 = vmatprep.subr.bf16.mxu1 %v1648_v15  ;;  %v1677_v7 = vld [vmem:[#allocation8 + $0x30] sm:$0xff]   ;;  %v1679_v9 = vld [vmem:[#allocation8 + $0x78] sm:$0xff]   ;;  %p1822_p9 = por %p1821_p7, %p1820_p5 }
  0x9e   : > { %1395 = vmatpush3.bf16.msra.mxu0 %v1646_v14  ;;  %v1680_v10 = vld [vmem:[#allocation8 + $0x38] sm:$0xff]  }
  0x9f   : > { %1396 = vmatprep.subr.bf16.mxu0 %v1647_v16  ;;  %v694_v16 = vshrl.u32 %v693_v13, 7  ;;  %v1688_v13 = vld [vmem:[#allocation9 + $0x38] sm:$0xff]   ;;  %p1823_p0 = pnand %p1822_p9, %p1816_p3 }
  0xa0   : > { %1473 = vmatpush3.bf16.msra.mxu1 %v1648_v15 }
  0xa1   : > { %1474 = vmatprep.subr.bf16.mxu1 %v1651_v18 }
  0xa2   : > { %1397 = vmatpush3.bf16.msra.mxu0 %v1649_v17  ;;  %v1690_v31 = vpop.eup %1689 }
  0xa3   : > { %1398 = vmatprep.subr.bf16.mxu0 %v1650_v19  ;;  %v1692_v33 = vpop.eup %1691  ;;  %v371_v34 = vadd.f32 1.0, %v1690_v31  ;;  %v1320_v19 = vld [vmem:[%s2298_s2] ss:$0 sm:$0xff] }
  0xa4   : > { %1475 = vmatpush3.bf16.msra.mxu1 %v1651_v18  ;;  %v372_v35 = vadd.f32 1.0, %v1692_v33 }
  0xa5   : > { %1476 = vmatprep.subr.bf16.mxu1 %v1654_v21  ;;  %v373_v36 = vmul.f32 %v371_v34, %v365_v28  ;;  %v696_v28 = vadd.s32 16, %v694_v16 }
  0xa6   : > { %1399 = vmatpush3.bf16.msra.mxu0 %v1652_v20  ;;  %v374_v37 = vmul.f32 %v372_v35, %v366_v29  ;;  %v699_v20 = vadd.s32 4294967295, %v694_v16 }
  0xa7   : > { %1400 = vmatprep.subr.bf16.mxu0 %v1653_v24  ;;  %375 = vst [vmem:[#allocation2 + $0x2] sm:$0xff] %v373_v36 }
  0xa8   : > { %1477 = vmatpush3.bf16.msra.mxu1 %v1654_v21  ;;  %376 = vst [vmem:[#allocation2 + $0xa] sm:$0xff] %v374_v37  ;;  %v396_v39 = vpack.c.bf16 %v374_v37, %v373_v36  ;;  %vm702_vm1 = vcmp.ge.s32.totalorder %v699_v20, 0  ;;  %v701_v36 = vadd.s32 4294967295, %v696_v28 }
  0xa9   : > { %1478 = vmatprep.subr.bf16.mxu1 %v1656_v30 }
  0xaa   : > { %1401 = vmatpush3.bf16.msra.mxu0 %v1655_v27  ;;  %1480 = vmatprep.mubr.bf16.mxu1 %v396_v39  ;;  %vm707_vm2 = vcmp.lt.s32.totalorder %v701_v36, 16 }
  0xab   : > { %1424 = vmatprep.subr.bf16.mxu0 %v1658_v51 }
  0xac   : > { %1479 = vmatpush3.bf16.msra.mxu1 %v1656_v30 }
  0xad   : > { %1484 = vmatprep.subr.bf16.mxu1 %v1913_v0 }
  0xae   : > { %v1314_v40 = vld [vmem:[#allocation2 + $0x1] sm:$0xff] }
  0xaf   : > { %1481 = vmatmul.mubr.bf16.vlgmr.msra.gmra.mrb[0].mxu1 %v397_v38  ;;  %v379_v41 = vld [vmem:[#allocation2] sm:$0xff]  ;;  %v1315_v42 = vld [vmem:[#allocation2 + $0x9] sm:$0xff]  ;;  %v1316_v44 = vld [vmem:[#allocation2 + $0x11] sm:$0x3] }
  0xb0   : > { %v380_v43 = vld [vmem:[#allocation2 + $0x8] sm:$0xff]  ;;  %v389_v45 = vpack.c.bf16 %v1315_v42, %v1314_v40  ;;  %v390_v47 = vpack.c.bf16 %v1316_v44, %v1316_v44  ;;  %v381_v48 = vld [vmem:[#allocation2 + $0x10] sm:$0x3]  ;;  %1485 = vmatpush3.bf16.msra.mxu1 %v1657_v50  ;;  %1500 = vmatprep.mubr.msk.bf16.mxu1 %vm1914_vm0, %v1913_v0 }
  0xb1   : > { %v382_v46 = vpack.c.bf16 %v380_v43, %v379_v41  ;;  %v383_v49 = vpack.c.bf16 %v381_v48, %v381_v48  ;;  %1486 = vmatprep.subr.bf16.mxu1 %v1913_v0 }
  0xb2   : > { %629 = vmatprep.mubr.bf16.mxu0 %v389_v45 }
  0xb3   : > { %630 = vmatmul.mubr.bf16.vlgmr.msra.gmra.mrb[0].mxu0 %v382_v46 }
  0xb4   : > { %637 = vmatprep.mubr.bf16.mxu0 %v390_v47  ;;  %1425 = vmatpush3.bf16.msra.mxu0 %v1659_v52 }
  0xb5   : > { %1487 = vmatpush3.bf16.msra.mxu1 %v1660_v53  ;;  %1426 = vmatprep.subr.bf16.mxu0 %v1661_v54 }
  0xb6   : > { %1488 = vmatprep.subr.bf16.mxu1 %v1913_v0 }
  0xb8   : > { %1427 = vmatpush3.bf16.msra.mxu0 %v1662_v55 }
  0xb9   : > { %1489 = vmatpush3.bf16.msra.mxu1 %v1663_v56  ;;  %1428 = vmatprep.subr.bf16.mxu0 %v1664_v57 }
  0xba   : > { %1490 = vmatprep.subr.bf16.mxu1 %v1913_v0 }
  0xbb   : > { %638 = vmatmul.mubr.bf16.gmra.mrb[4].mxu0 %v383_v49 }
  0xbc   : > { %1429 = vmatpush3.bf16.msra.mxu0 %v1665_v58 }
  0xbd   : > { %1491 = vmatpush3.bf16.msra.mxu1 %v1666_v59  ;;  %1430 = vmatprep.subr.bf16.mxu0 %v1667_v60 }
  0xbe   : > { %1492 = vmatprep.subr.bf16.mxu1 %v1913_v0 }
  0xc0   : > { %1431 = vmatpush3.bf16.msra.mxu0 %v1668_v61 }
  0xc1   : > { %1493 = vmatpush3.bf16.msra.mxu1 %v1669_v62  ;;  %1432 = vmatprep.subr.bf16.mxu0 %v1670_v63  ;;  %v1681_v63 = vld [vmem:[#allocation9] sm:$0xff]  }
  0xc2   : > { %1494 = vmatprep.subr.bf16.mxu1 %v1913_v0 }
  0xc4   : > { %1433 = vmatpush3.bf16.msra.mxu0 %v1671_v1 }
  0xc5   : > { %1495 = vmatpush3.bf16.msra.mxu1 %v1672_v2  ;;  %1434 = vmatprep.subr.bf16.mxu0 %v1673_v3 }
  0xc6   : > { %1496 = vmatprep.subr.bf16.mxu1 %v1913_v0 }
  0xc8   : > { %1435 = vmatpush3.bf16.msra.mxu0 %v1674_v4 }
  0xc9   : > { %1497 = vmatpush3.bf16.msra.mxu1 %v1675_v5  ;;  %1436 = vmatprep.subr.bf16.mxu0 %v1676_v6 }
  0xca   : > { %1498 = vmatprep.subr.bf16.mxu1 %v1913_v0 }
  0xcc   : > { %1437 = vmatpush3.bf16.msra.mxu0 %v1677_v7  ;;  %v1682_v7 = vld [vmem:[#allocation9 + $0x8] sm:$0xff]  }
  0xcd   : > { %1499 = vmatpush3.bf16.msra.mxu1 %v1678_v8  ;;  %1438 = vmatprep.subr.bf16.mxu0 %v1679_v9  ;;  %v1683_v8 = vld [vmem:[#allocation9 + $0x10] sm:$0xff]   ;;  %v1684_v9 = vld [vmem:[#allocation9 + $0x18] sm:$0xff]  }
  0xce   : > { %1504 = vmatprep.subr.bf16.mxu1 %v1913_v0 }
  0xd0   : > { %1439 = vmatpush3.bf16.msra.mxu0 %v1680_v10  ;;  %v1685_v10 = vld [vmem:[#allocation9 + $0x20] sm:$0xff]  }
 0x182   : > { %v1482_v11 = vpop.f32.mrb[0].mxu1 }
 0x183   : > { %v679_v12 = vpop.f32.mrb[1].mxu1 }
 0x184   : > { %v1483_v14 = vpop.f32.mrb[2].mxu1 }
 0x185   : > { %v682_v15 = vpop.f32.mrb[3].mxu1  ;;  %v1042_v14 = vpack.c.bf16 %v2202_v23, %v2199_v22 }
 0x186   : > { %v1402_v17 = vpop.f32.mrb[0].mxu0 }
 0x187   : > { %v1403_v18 = vpop.f32.mrb[1].mxu0 }
 0x188   : > { %v1404_v21 = vadd.f32 %v1403_v18, %v1402_v17  ;;  %v1405_v24 = vpop.f32.mrb[2].mxu0 }
 0x189   : > { %v1406_v25 = vpop.f32.mrb[3].mxu0 }
 0x18a   : > { %v1407_v26 = vadd.f32 %v1406_v25, %v1405_v24  ;;  %v632_v27 = vadd.f32 %v1404_v21, %v1320_v19  ;;  %v1345_v21 = vld [vmem:[%s2300_s4] ss:$0 sm:$0xff] }
 0x18c   : > { %v680_v29 = vadd.f32 %v679_v12, %v632_v27  ;;  %v635_v30 = vadd.f32 %v1407_v26, %v1320_v19  ;;  %v1687_v12 = vld [vmem:[#allocation9 + $0x30] sm:$0xff]  }
 0x18e   : > { %v717_v31 = vsel %vm702_vm1, %v680_v29, 0.0  ;;  %v683_v32 = vadd.f32 %v682_v15, %v635_v30  ;;  %v1408_v33 = vpop.f32.mrb[4].mxu0 }
 0x18f   : > { %v723_v34 = vmul.f32 0.70710677, %v717_v31  ;;  %v1409_v35 = vpop.f32.mrb[5].mxu0  ;;  %v720_v47 = vmul.f32 0.5, %v717_v31 }
 0x190   : > { %v724_v37 = vmul.f32 0.70710677, %v683_v32  ;;  %v1410_v38 = vadd.f32 %v1409_v35, %v1408_v33  ;;  %v1411_v39 = vpop.f32.mrb[6].mxu0  ;;  %v721_v49 = vmul.f32 0.5, %v683_v32 }
 0x191   : > { %1693 = verf.f32 %v723_v34  ;;  %v1412_v40 = vpop.f32.mrb[7].mxu0 }
 0x192   : > { %1695 = verf.f32 %v724_v37  ;;  %v640_v41 = vadd.f32 %v1410_v38, %v1320_v19 }
 0x194   : > { %v688_v42 = vadd.f32 %v1482_v11, %v640_v41  ;;  %v1686_v11 = vld [vmem:[#allocation9 + $0x28] sm:$0xff]  }
 0x196   : > { %v719_v43 = vsel %vm707_vm2, %v688_v42, 0.0 }
 0x197   : > { %v725_v44 = vmul.f32 0.70710677, %v719_v43  ;;  %v722_v55 = vmul.f32 0.5, %v719_v43 }
 0x199   : > { %1697 = verf.f32 %v725_v44 }
 0x19b   : > { %v1694_v45 = vpop.eup %1693 }
 0x19c   : > { %v1696_v46 = vpop.eup %1695  ;;  %v729_v48 = vadd.f32 1.0, %v1694_v45 }
 0x19d   : > { %v730_v50 = vadd.f32 1.0, %v1696_v46 }
 0x19e   : > { %v732_v51 = vmul.f32 %v729_v48, %v720_v47 }
 0x19f   : > { %v733_v52 = vmul.f32 %v730_v50, %v721_v49 }
 0x1a1   : > { %v735_v53 = vpack.c.bf16 %v733_v52, %v732_v51 }
 0x1a3   : > { %v1698_v54 = vpop.eup %1697  ;;  %v741_v57 = vshll.u32 %v735_v53, 16  ;;  %v754_v61 = vrot.slane %v735_v53, 1  ;;  %v739_v1 = vshrl.u32 %v735_v53, 16 }
 0x1a4   : > { %v731_v56 = vadd.f32 1.0, %v1698_v54 }
 0x1a5   : > { %v743_v60 = vrot.slane %v741_v57, 1 }
 0x1a6   : > { %v734_v58 = vmul.f32 %v731_v56, %v722_v55 }
 0x1a7   : > { %v744_v4 = vor.u32 %v743_v60, %v739_v1 }
 0x1a8   : > { %v736_v59 = vpack.c.bf16 %v734_v58, %v734_v58 }
 0x1aa   : > { %v755_v62 = vrot.slane %v736_v59, 1  ;;  %v746_v2 = vshll.u32 %v736_v59, 16 }
 0x1ac   : > { %v756_v3 = vsel %vm753_vm3, %v754_v61, %v755_v62  ;;  %v748_v5 = vrot.slane %v746_v2, 1 }
 0x1ad   : > { %1501 = vmatmul.mubr.bf16.vlgmr.msra.gmra.mrb[4].mxu1 %v756_v3 }
 0x1ae   : > { %1505 = vmatpush3.bf16.msra.mxu1 %v1681_v63  ;;  %v749_v6 = vsel %vm737_vm4, %v744_v4, %v748_v5  ;;  %1520 = vmatprep.mubr.msk.bf16.mxu1 %vm1914_vm0, %v1913_v0 }
 0x1af   : > { %989 = vmatprep.mubr.bf16.mxu0 %v749_v6  ;;  %1506 = vmatprep.subr.bf16.mxu1 %v1913_v0 }
 0x1b0   : > { %990 = vmatmul.mubr.bf16.vlgmr.msra.gmra.mrb[8].mxu0 %v735_v53 }
 0x1b2   : > { %1507 = vmatpush3.bf16.msra.mxu1 %v1682_v7 }
 0x1b3   : > { %1508 = vmatprep.subr.bf16.mxu1 %v1913_v0 }
 0x1b6   : > { %1509 = vmatpush3.bf16.msra.mxu1 %v1683_v8 }
 0x1b7   : > { %1510 = vmatprep.subr.bf16.mxu1 %v1913_v0 }
 0x1ba   : > { %1511 = vmatpush3.bf16.msra.mxu1 %v1684_v9 }
 0x1bb   : > { %1512 = vmatprep.subr.bf16.mxu1 %v1913_v0 }
 0x1be   : > { %1513 = vmatpush3.bf16.msra.mxu1 %v1685_v10 }
 0x1bf   : > { %1514 = vmatprep.subr.bf16.mxu1 %v1913_v0 }
 0x1c2   : > { %1515 = vmatpush3.bf16.msra.mxu1 %v1686_v11 }
 0x1c3   : > { %1516 = vmatprep.subr.bf16.mxu1 %v1913_v0 }
 0x1c6   : > { %1517 = vmatpush3.bf16.msra.mxu1 %v1687_v12 }
 0x1c7   : > { %1518 = vmatprep.subr.bf16.mxu1 %v1913_v0  ;;  %v1370_v0 = vld [vmem:[%s2328_s15] ss:$0 sm:$0xff] }
 0x1ca   : > { %1519 = vmatpush3.bf16.msra.mxu1 %v1688_v13 }
 0x1cd   : > { %1521 = vmatmul.mubr.bf16.vlgmr.msra.gmra.mrb[4].mxu1 %v1042_v14 }
 0x283   : > { %v1440_v15 = vpop.f32.mrb[8].mxu0 }
 0x284   : > { %v1441_v16 = vpop.f32.mrb[9].mxu0 }
 0x285   : > { %v1442_v17 = vadd.f32 %v1441_v16, %v1440_v15  ;;  %v1443_v18 = vpop.f32.mrb[10].mxu0 }
 0x286   : > { %v1444_v19 = vpop.f32.mrb[11].mxu0 }
 0x287   : > { %v1445_v20 = vadd.f32 %v1444_v19, %v1443_v18  ;;  %v992_v24 = vadd.f32 %v1442_v17, %v1345_v21 }
 0x289   : > { %v995_v25 = vadd.f32 %v1445_v20, %v1345_v21  ;;  %v1524_v22 = vadd.f32 %v1370_v0, %v992_v24 }
 0x28b   : > { %v1526_v28 = vadd.f32 %v1370_v0, %v995_v25 }
 0x2a0   : > { %v1148_v23 = vpop.f32.mrb[4].mxu1 }
 0x2a1   : > { %v1525_v26 = vadd.f32 %v1524_v22, %v1148_v23  ;;  %v1522_v27 = vpop.f32.mrb[5].mxu1 }
 0x2a2   : > { %v1151_v29 = vpop.f32.mrb[6].mxu1 }
 0x2a3   : > { %1157 = vst [vmem:[%s354_s24] sm:$0xff] %v1525_v26  ;;  %v1527_v30 = vadd.f32 %v1526_v28, %v1151_v29  ;;  %v1523_v31 = vpop.f32.mrb[7].mxu1 }
 0x2a5   : > { %1158 = vst [vmem:[%s354_s24 + $0x8] sm:$0xff] %v1527_v30 }
 0x2a6   : > { %1826 = shalt.err (!%p1823_p0)
}
 0x2a7   : > { %s1827_s13 = scalar_lea.hbm %s2247_s20, 256  ;;  %s1831_s21 = scalar_lea.hbm %s2329_s6, 512 }
 0x2a8   : > { %p1828_p4 = scmp.ne.s32.totalorder %s2247_s20, %s1827_s13  ;;  %p1832_p12 = scmp.lt.u32.totalorder %s2247_s20, %s2329_s6 }
 0x2a9   : > { %p1833_p1 = scmp.lt.u32.totalorder %s1831_s21, %s1827_s13  ;;  %p1835_p13 = scmp.lt.u32.totalorder %s1827_s13, %s2247_s20 }
 0x2aa   : > { %p1829_p2 = pnand %p1828_p4, %p2118_p10 }
 0x2ab   : > { %p1834_p11 = por %p1833_p1, %p1832_p12 }
 0x2ac   : > { %p1830_p8 = pneg %p1829_p2 }
 0x2ad   : > { %p1836_p6 = por %p1835_p13, %p1834_p11 }
 0x2af   : > { %p1837_p3 = pnand %p1836_p6, %p1830_p8 }
 0x2b1   : > { %1840 = shalt.err (!%p1837_p3)
}
 0x2b2   : > { %s1916_s8 = smov 128   ;;  %s1917_s17 = smov 8  }
 0x2b3   : > { %1546 = dma.vmem_to_hbm [thread:$0]  (%p2118_p10), %s2242_s30, 256, %s2247_s20, %s1160_s27, %s1916_s8, %s1916_s8, %s1917_s17  }
 0x2b4 PF: > { %s2330_s18 = sld [smem:[#allocation16_spill]]  ;;  %s2331_s12 = sld [smem:[#allocation17_spill]] }
 0x2b5   : > { %p2333_p7 = scmp.ge.s32.totalorder %s1903_s29, 2 }
 0x2ba   : > { %s1190_s22 = sand.u32 1, %s2330_s18   ;;  %p2332_p5 = scmp.ne.s32.totalorder %s2331_s12, 0 }
 0x2bb   : > { %s1191_s9 = scalar_lea.sflag [#allocation5], %s1190_s22 }
 0x2bc   : > { %p1563_p9 = pnand %p2333_p7, %p2332_p5 }
 0x2be   : > { %1878 = dma.done.wait (!%p1563_p9), %s1191_s9, 256  }
 0x2bf   : > { %1880 = vsyncadd (!%p1563_p9), %s1191_s9, 4294967040  ;;  %s25_s29 = sadd.s32 1, %s1903_s29   ;;  %s2334_s24 = smov %s1887_s25 }
 0x2c0   : > { %p22_p0 = scmp.ge.s32.totalorder %s25_s29, 4   ;;  %s2335_s25 = smov %s1891_s26 }
 0x2c1   : > { %s2336_s26 = smov %s2130_s23  ;;  %s2337_s27 = smov %s1899_s28 }
 0x2c2   : > { %s2338_s28 = smov %s2340_s16  ;;  %24 = sbr.rel (!%p22_p0) target bundleno = 11 (0xb), region = 113 }
 0x2c9   :  { %1196 = vsyncpa [#allocation4], 1 }
 0x2ca   :  { %1198 = vsyncpa [#allocation4 + $0x1], 1 }
 0x2cb   :  { %1199 = vsyncpa [#allocation7], 1 }
 0x2cc   :  { %1200 = vsyncpa [#allocation10], 1 }
 0x2cd   :  { %1201 = vsyncpa [#allocation5], 1 }
 0x2ce   :  { %1203 = vsyncpa [#allocation5 + $0x1], 1 }

</bundles_post_ra>
